<compile_context>
chip_gen: v6e
topology: v6e:2x2x1
jax: 0.10.0
libtpu: 0.0.40
codegen_flags: <defaults>
</compile_context>

<pallas_src>
import functools

import jax
import jax.numpy as jnp
from jax.experimental import pallas as pl
from jax.experimental.pallas import tpu as pltpu


def _round_up(x, m):
    return (x + m - 1) // m * m


def decoder_kernel(z_ref, w1_ref, b1_ref, w2_ref, b2_ref, out_ref):
    # fc1 + relu: bf16 MXU matmul, f32 accumulation, f32 elementwise tail.
    h = jnp.dot(z_ref[...], w1_ref[...], preferred_element_type=jnp.float32)
    h = jnp.maximum(h + b1_ref[...], 0.0)                 # (TB, H) + (1, H)

    # fc2 + sigmoid (tanh identity -> single EUP transcendental).
    o = jnp.dot(h.astype(jnp.bfloat16), w2_ref[...],
                preferred_element_type=jnp.float32)
    o = o + b2_ref[...]                                   # (TB, D) + (1, D)
    out_ref[...] = (0.5 * (1.0 + jnp.tanh(0.5 * o))).astype(out_ref.dtype)


@functools.partial(jax.jit, static_argnames=("batch_tile",))
def decoder_forward(z, w1, b1, w2, b2, *, batch_tile=512):
    """z: (B, Z) f32; w1: (Z, H); b1: (H,)/(1,H); w2: (H, D); b2: (D,)/(1,D)."""
    B, Z = z.shape
    H = w1.shape[1]
    D = w2.shape[1]

    # Weights in bf16 for the MXU; biases stay f32 for the f32 tail.
    w1 = w1.astype(jnp.bfloat16)
    w2 = w2.astype(jnp.bfloat16)
    b1 = jnp.reshape(b1, (1, H)).astype(jnp.float32)
    b2 = jnp.reshape(b2, (1, D)).astype(jnp.float32)

    # Batch tiling: sublane-aligned tile, pad batch (only) up to a multiple.
    Bp8 = _round_up(max(B, 8), 8)
    TB = min(batch_tile, Bp8)
    Bp = _round_up(Bp8, TB)

    zp = z.astype(jnp.bfloat16)
    if Bp != B:
        zp = jnp.zeros((Bp, Z), jnp.bfloat16).at[:B, :].set(zp)

    out = pl.pallas_call(
        decoder_kernel,
        out_shape=jax.ShapeDtypeStruct((Bp, D), jnp.float32),
        grid=(Bp // TB,),
        in_specs=[
            pl.BlockSpec((TB, Z), lambda i: (i, 0)),   # z: tiled over batch
            pl.BlockSpec((Z, H), lambda i: (0, 0)),    # weights/biases stay
            pl.BlockSpec((1, H), lambda i: (0, 0)),    # VMEM-resident across
            pl.BlockSpec((H, D), lambda i: (0, 0)),    # batch tiles
            pl.BlockSpec((1, D), lambda i: (0, 0)),
        ],
        out_specs=pl.BlockSpec((TB, D), lambda i: (i, 0)),
        compiler_params=pltpu.CompilerParams(
            dimension_semantics=("parallel",),          # megacore / dual-TC
            vmem_limit_bytes=32 * 1024 * 1024,          # headroom on v5e
        ),
    )(zp, w1, b1, w2, b2)

    return out if Bp == B else out[:B]


def init_params(key, z_dim=20, hidden_dim=400, output_dim=784):
    """Deterministic PyTorch-Linear-like init (uniform in +-1/sqrt(fan_in))."""
    k1, k2, k3, k4 = jax.random.split(key, 4)
    lim1 = 1.0 / jnp.sqrt(z_dim)
    lim2 = 1.0 / jnp.sqrt(hidden_dim)
    # Stored pre-transposed: (in_features, out_features), matches z @ W.
    w1 = jax.random.uniform(k1, (z_dim, hidden_dim), jnp.float32, -lim1, lim1)
    b1 = jax.random.uniform(k2, (1, hidden_dim), jnp.float32, -lim1, lim1)
    w2 = jax.random.uniform(k3, (hidden_dim, output_dim), jnp.float32, -lim2, lim2)
    b2 = jax.random.uniform(k4, (1, output_dim), jnp.float32, -lim2, lim2)
    return w1, b1, w2, b2


def decoder_reference(z, w1, b1, w2, b2):
    """Pure-JAX reference using the same bf16 matmul operands as the kernel."""
    h = jnp.dot(z.astype(jnp.bfloat16), w1.astype(jnp.bfloat16),
                preferred_element_type=jnp.float32) + b1
    h = jnp.maximum(h, 0.0)
    o = jnp.dot(h.astype(jnp.bfloat16), w2.astype(jnp.bfloat16),
                preferred_element_type=jnp.float32) + b2
    return jax.nn.sigmoid(o)


if __name__ == "__main__":
    key = jax.random.PRNGKey(0)
    kz, kp = jax.random.split(key)

    # B=16: one full bf16 sublane-packed tile.
    B, Z_DIM, HIDDEN, OUT = 16, 20, 400, 784
    z = jax.random.normal(kz, (B, Z_DIM), dtype=jnp.float32)
    w1, b1, w2, b2 = init_params(kp, Z_DIM, HIDDEN, OUT)

    out = decoder_forward(z, w1, b1, w2, b2)
    out = jax.block_until_ready(out)

    ref = decoder_reference(z, w1, b1, w2, b2)
    assert out.shape == (B, OUT), out.shape
    max_err = float(jnp.max(jnp.abs(out - ref)))
    assert jnp.allclose(out, ref, atol=2e-3, rtol=0.0), f"mismatch, max_err={max_err}"

    print("KERNEL_OK")
</pallas_src>

<mosaic_0001>
module attributes {stable_mosaic.version = 11 : i64} {
  func.func @decoder_kernel(%arg0: i32, %arg1: memref<16x20xbf16, #tpu.memory_space<vmem>>, %arg2: memref<20x400xbf16, #tpu.memory_space<vmem>>, %arg3: memref<1x400xf32, #tpu.memory_space<vmem>>, %arg4: memref<400x784xbf16, #tpu.memory_space<vmem>>, %arg5: memref<1x784xf32, #tpu.memory_space<vmem>>, %arg6: memref<16x784xf32, #tpu.memory_space<vmem>>) attributes {dimension_semantics = [#tpu.dimension_semantics<parallel>], iteration_bounds = array<i64: 1>, scalar_prefetch = 0 : i64, scratch_operands = 0 : i64, tpu.core_type = #tpu.core_type<tc>, window_params = [{transform_indices = @transform_0, window_bounds = array<i64: 16, 20>}, {pipeline_mode = #tpu.pipeline_mode<synchronous>, transform_indices = @transform_1, window_bounds = array<i64: 20, 400>}, {pipeline_mode = #tpu.pipeline_mode<synchronous>, transform_indices = @transform_2, window_bounds = array<i64: 1, 400>}, {pipeline_mode = #tpu.pipeline_mode<synchronous>, transform_indices = @transform_3, window_bounds = array<i64: 400, 784>}, {pipeline_mode = #tpu.pipeline_mode<synchronous>, transform_indices = @transform_4, window_bounds = array<i64: 1, 784>}, {transform_indices = @transform_5, window_bounds = array<i64: 16, 784>}]} {
    %c0 = arith.constant 0 : index
    %c0_0 = arith.constant 0 : index
    %0 = vector.load %arg1[%c0, %c0_0] : memref<16x20xbf16, #tpu.memory_space<vmem>>, vector<16x20xbf16>
    %c0_1 = arith.constant 0 : index
    %c0_2 = arith.constant 0 : index
    %1 = vector.load %arg2[%c0_1, %c0_2] : memref<20x400xbf16, #tpu.memory_space<vmem>>, vector<20x400xbf16>
    %cst = arith.constant dense<0.000000e+00> : vector<16x400xf32>
    %2 = tpu.matmul %0, %1, %cst {dimension_numbers = #tpu.dot_dimension_numbers<[1], [0], [0], [1], [0, 0, 1, 1], [], []>} : vector<16x20xbf16>, vector<20x400xbf16>, vector<16x400xf32> -> vector<16x400xf32>
    %c0_3 = arith.constant 0 : index
    %c0_4 = arith.constant 0 : index
    %3 = vector.load %arg3[%c0_3, %c0_4] : memref<1x400xf32, #tpu.memory_space<vmem>>, vector<1x400xf32>
    %4 = vector.broadcast %3 : vector<1x400xf32> to vector<16x400xf32>
    %5 = arith.addf %2, %4 : vector<16x400xf32>
    %cst_5 = arith.constant 0.000000e+00 : f32
    %6 = vector.broadcast %cst_5 : f32 to vector<16x400xf32>
    %7 = arith.maximumf %5, %6 : vector<16x400xf32>
    %8 = arith.truncf %7 : vector<16x400xf32> to vector<16x400xbf16>
    %c0_6 = arith.constant 0 : index
    %c0_7 = arith.constant 0 : index
    %9 = vector.load %arg4[%c0_6, %c0_7] : memref<400x784xbf16, #tpu.memory_space<vmem>>, vector<400x784xbf16>
    %cst_8 = arith.constant dense<0.000000e+00> : vector<16x784xf32>
    %10 = tpu.matmul %8, %9, %cst_8 {dimension_numbers = #tpu.dot_dimension_numbers<[1], [0], [0], [1], [0, 0, 1, 1], [], []>} : vector<16x400xbf16>, vector<400x784xbf16>, vector<16x784xf32> -> vector<16x784xf32>
    %c0_9 = arith.constant 0 : index
    %c0_10 = arith.constant 0 : index
    %11 = vector.load %arg5[%c0_9, %c0_10] : memref<1x784xf32, #tpu.memory_space<vmem>>, vector<1x784xf32>
    %12 = vector.broadcast %11 : vector<1x784xf32> to vector<16x784xf32>
    %13 = arith.addf %10, %12 : vector<16x784xf32>
    %cst_11 = arith.constant 5.000000e-01 : f32
    %14 = vector.broadcast %cst_11 : f32 to vector<16x784xf32>
    %15 = arith.mulf %14, %13 : vector<16x784xf32>
    %16 = math.tanh %15 : vector<16x784xf32>
    %cst_12 = arith.constant 1.000000e+00 : f32
    %17 = vector.broadcast %cst_12 : f32 to vector<16x784xf32>
    %18 = arith.addf %17, %16 : vector<16x784xf32>
    %cst_13 = arith.constant 5.000000e-01 : f32
    %19 = vector.broadcast %cst_13 : f32 to vector<16x784xf32>
    %20 = arith.mulf %19, %18 : vector<16x784xf32>
    %c0_14 = arith.constant 0 : index
    %c0_15 = arith.constant 0 : index
    %21 = vector.load %arg6[%c0_14, %c0_15] : memref<16x784xf32, #tpu.memory_space<vmem>>, vector<16x784xf32>
    tpu.vector_store %arg6[%c0_14, %c0_15], %20 {strides = array<i32>} : memref<16x784xf32, #tpu.memory_space<vmem>>, vector<16x784xf32>,
    return
  }
  func.func @transform_0(%arg0: i32) -> (i32, i32) {
    %c0_i32 = arith.constant 0 : i32
    %c0_i32_0 = arith.constant 0 : i32
    return %arg0, %c0_i32 : i32, i32
  }
  func.func @transform_1(%arg0: i32) -> (i32, i32) {
    %c0_i32 = arith.constant 0 : i32
    %c0_i32_0 = arith.constant 0 : i32
    %c0_i32_1 = arith.constant 0 : i32
    return %c0_i32, %c0_i32_0 : i32, i32
  }
  func.func @transform_2(%arg0: i32) -> (i32, i32) {
    %c0_i32 = arith.constant 0 : i32
    %c0_i32_0 = arith.constant 0 : i32
    %c0_i32_1 = arith.constant 0 : i32
    return %c0_i32, %c0_i32_0 : i32, i32
  }
  func.func @transform_3(%arg0: i32) -> (i32, i32) {
    %c0_i32 = arith.constant 0 : i32
    %c0_i32_0 = arith.constant 0 : i32
    %c0_i32_1 = arith.constant 0 : i32
    return %c0_i32, %c0_i32_0 : i32, i32
  }
  func.func @transform_4(%arg0: i32) -> (i32, i32) {
    %c0_i32 = arith.constant 0 : i32
    %c0_i32_0 = arith.constant 0 : i32
    %c0_i32_1 = arith.constant 0 : i32
    return %c0_i32, %c0_i32_0 : i32, i32
  }
  func.func @transform_5(%arg0: i32) -> (i32, i32) {
    %c0_i32 = arith.constant 0 : i32
    %c0_i32_0 = arith.constant 0 : i32
    return %arg0, %c0_i32 : i32, i32
  }
}

</mosaic_0001>

<bundles_post_ra>
// kernel: decoder_forward.1
= control target key start
LH: loop header
LB: loop body
LE: loop exit
PB: predicated region body
PF: predicated region fallthrough
CT: control target
= control target key end

     0   :  { %vm91_vm0 = vcmask 1041408   ;;  %v2298_v4 = vmov 0   ;;  %vm87_vm1 = vcmask 162816   ;;  %s2968_s0 = inlined_call_operand.vmem [shape: bf16[16,20], index: 0, kind: input, shape index: {}]   ;;  %s2969_s1 = inlined_call_operand.vmem [shape: bf16[20,400], index: 1, kind: input, shape index: {}]   ;;  %s2970_s2 = inlined_call_operand.vmem [shape: f32[1,400], index: 2, kind: input, shape index: {}]   ;;  %s2971_s3 = inlined_call_operand.vmem [shape: bf16[400,784], index: 3, kind: input, shape index: {}]   ;;  %s2972_s4 = inlined_call_operand.vmem [shape: f32[1,784], index: 4, kind: input, shape index: {}]   ;;  %s2973_s5 = inlined_call_operand.hbm [shape: f32[16,784], index: 5, kind: output, shape index: {}]  }
   0x1   :  { %v28_v0 = vld [vmem:[%s2969_s1 + $0x20] sm:$0x33]  ;;  %136 = vmatprep.mubr.bf16.mxu1 %v2298_v4  ;;  %v29_v5 = vld [vmem:[%s2969_s1 + $0x28] sm:$0x33]  ;;  %v2001_v12 = vld [vmem:[%s2971_s3 + $0x154] ss:$28 sps:$4 sm:$0xff]  }
   0x2   :  { %v1775_v1 = vcombine.high %v28_v0, %v28_v0  ;;  %v1774_v2 = vcombine.low %v28_v0, %v28_v0  ;;  %v1989_v3 = vld [vmem:[%s2969_s1 + $0x4] ss:$16 sps:$4 sm:$0xff]   ;;  %v1991_v7 = vld [vmem:[%s2969_s1] ss:$16 sps:$4 sm:$0xff]   ;;  %v1777_v8 = vcombine.high %v29_v5, %v29_v5  ;;  %v1776_v9 = vcombine.low %v29_v5, %v29_v5  ;;  %v1998_v10 = vld [vmem:[%s2971_s3 + $0x18c] ss:$28 sps:$4 sm:$0xff]  }
   0x3   :  { %v2000_v11 = vld [vmem:[%s2971_s3 + $0x188] ss:$28 sps:$4 sm:$0xff]   ;;  %1343 = vmatprep.subr.bf16.mxu0 %v1998_v10  ;;  %v1997_v15 = vld [vmem:[%s2969_s1 + $0xc] ss:$16 sps:$4 sm:$0xff]   ;;  %v2006_v19 = vld [vmem:[%s2971_s3 + $0x118] ss:$28 sps:$4 sm:$0xff]  }
   0x4   :  { %1778 = vmatprep.subr.msk.bf16.mxu1 %vm91_vm0, %v1775_v1  ;;  %v93_v6 = vsel %vm91_vm0, %v1774_v2, 0  ;;  %v1992_v13 = vld [vmem:[%s2968_s0] sm:$0xff]   ;;  %1344 = vmatpush1.bf16.msra.mxu0 %v2000_v11  ;;  %v99_v14 = vsel %vm91_vm0, %v1776_v9, 0  ;;  %v2003_v16 = vld [vmem:[%s2971_s3 + $0x150] ss:$28 sps:$4 sm:$0xff]  }
   0x5   :  { %117 = vmatpush1.bf16.msra.mxu1 %v93_v6  ;;  %1345 = vmatprep.subr.bf16.mxu0 %v2001_v12  ;;  %v2004_v17 = vld [vmem:[%s2971_s3 + $0x11c] ss:$28 sps:$4 sm:$0xff]   ;;  %v2007_v20 = vld [vmem:[%s2971_s3 + $0xe4] ss:$28 sps:$4 sm:$0xff]   ;;  %v2010_v22 = vld [vmem:[%s2971_s3 + $0xac] ss:$28 sps:$4 sm:$0xff]  }
   0x6   :  { %118 = vmatprep.subr.bf16.mxu1 %v1989_v3  ;;  %v1995_v18 = vld [vmem:[%s2969_s1 + $0x8] ss:$16 sps:$4 sm:$0xff]   ;;  %v2009_v21 = vld [vmem:[%s2971_s3 + $0xe0] ss:$28 sps:$4 sm:$0xff]   ;;  %v2033_v26 = vld [vmem:[%s2971_s3 + $0x4d0] ss:$28 sps:$4 sm:$0xff]  }
   0x7   :  { %v2027_v23 = vld [vmem:[%s2971_s3 + $0x508] ss:$28 sps:$4 sm:$0xff]   ;;  %v2035_v27 = vld [vmem:[%s2971_s3 + $0x4d4] ss:$28 sps:$4 sm:$0xff]   ;;  %v2041_v29 = vld [vmem:[%s2971_s3 + $0x49c] ss:$28 sps:$4 sm:$0xff]  }
   0x8   :  { %1346 = vmatpush1.bf16.msra.mxu0 %v2003_v16  ;;  %v2029_v24 = vld [vmem:[%s2971_s3 + $0x50c] ss:$28 sps:$4 sm:$0xff]   ;;  %v2013_v28 = vld [vmem:[%s2971_s3 + $0x74] ss:$28 sps:$4 sm:$0xff]   ;;  %v2016_v32 = vld [vmem:[%s2971_s3 + $0x3c] ss:$28 sps:$4 sm:$0xff]  }
   0x9   :  { %119 = vmatpush1.bf16.msra.mxu1 %v1991_v7  ;;  %1347 = vmatprep.subr.bf16.mxu0 %v2004_v17  ;;  %v2012_v25 = vld [vmem:[%s2971_s3 + $0xa8] ss:$28 sps:$4 sm:$0xff]   ;;  %v2015_v30 = vld [vmem:[%s2971_s3 + $0x70] ss:$28 sps:$4 sm:$0xff]   ;;  %v2039_v31 = vld [vmem:[%s2971_s3 + $0x498] ss:$28 sps:$4 sm:$0xff]  }
   0xa   :  { %1780 = vmatprep.subr.msk.bf16.mxu1 %vm91_vm0, %v1777_v8  ;;  %v2047_v33 = vld [vmem:[%s2971_s3 + $0x464] ss:$28 sps:$4 sm:$0xff]   ;;  %v2018_v34 = vld [vmem:[%s2971_s3 + $0x38] ss:$28 sps:$4 sm:$0xff]   ;;  %v2022_v38 = vld [vmem:[%s2971_s3 + $0x34c] ss:$28 sps:$4 sm:$0xff]  }
   0xb   :  { %v2045_v35 = vld [vmem:[%s2971_s3 + $0x460] ss:$28 sps:$4 sm:$0xff]   ;;  %v2024_v39 = vld [vmem:[%s2971_s3 + $0x348] ss:$28 sps:$4 sm:$0xff]   ;;  %v2025_v40 = vld [vmem:[%s2971_s3 + $0x314] ss:$28 sps:$4 sm:$0xff]  }
   0xc   :  { %1779 = vmatmul.mubr.msk.bf16.vlgmr.msra.gmra.mxu1 %vm87_vm1, %v1992_v13  ;;  %1348 = vmatpush1.bf16.msra.mxu0 %v2006_v19  ;;  %v2019_v36 = vld [vmem:[%s2971_s3 + $0x4] ss:$28 sps:$4 sm:$0xff]   ;;  %v2030_v41 = vld [vmem:[%s2971_s3 + $0x310] ss:$28 sps:$4 sm:$0xff]   ;;  %v2031_v42 = vld [vmem:[%s2971_s3 + $0x2dc] ss:$28 sps:$4 sm:$0xff]  }
   0xd   :  { %160 = vmatpush1.bf16.msra.mxu1 %v99_v14  ;;  %179 = vmatprep.mubr.bf16.mxu1 %v2298_v4  ;;  %v2021_v37 = vld [vmem:[%s2971_s3] ss:$28 sps:$4 sm:$0xff]   ;;  %v2036_v43 = vld [vmem:[%s2971_s3 + $0x2d8] ss:$28 sps:$4 sm:$0xff]   ;;  %v2043_v46 = vld [vmem:[%s2971_s3 + $0x26c] ss:$28 sps:$4 sm:$0xff]  }
   0xe   :  { %161 = vmatprep.subr.bf16.mxu1 %v1997_v15  ;;  %1349 = vmatprep.subr.bf16.mxu0 %v2007_v20  ;;  %v2037_v44 = vld [vmem:[%s2971_s3 + $0x2a4] ss:$28 sps:$4 sm:$0xff]   ;;  %v2049_v48 = vld [vmem:[%s2971_s3 + $0x234] ss:$28 sps:$4 sm:$0xff]   ;;  %v2053_v49 = vld [vmem:[%s2971_s3 + $0x42c] ss:$28 sps:$4 sm:$0xff]  }
   0xf   :  { %v2042_v45 = vld [vmem:[%s2971_s3 + $0x2a0] ss:$28 sps:$4 sm:$0xff]   ;;  %v2048_v47 = vld [vmem:[%s2971_s3 + $0x268] ss:$28 sps:$4 sm:$0xff]   ;;  %v2054_v51 = vld [vmem:[%s2971_s3 + $0x230] ss:$28 sps:$4 sm:$0xff]  }
  0x10   :  { %1350 = vmatpush1.bf16.msra.mxu0 %v2009_v21  ;;  %v2051_v50 = vld [vmem:[%s2971_s3 + $0x428] ss:$28 sps:$4 sm:$0xff]   ;;  %v2055_v52 = vld [vmem:[%s2971_s3 + $0x1fc] ss:$28 sps:$4 sm:$0xff]   ;;  %v2059_v53 = vld [vmem:[%s2971_s3 + $0x3f4] ss:$28 sps:$4 sm:$0xff]  }
  0x11   :  { %162 = vmatpush1.bf16.msra.mxu1 %v1995_v18  ;;  %1351 = vmatprep.subr.bf16.mxu0 %v2010_v22  ;;  %v2057_v54 = vld [vmem:[%s2971_s3 + $0x3f0] ss:$28 sps:$4 sm:$0xff]   ;;  %v2060_v55 = vld [vmem:[%s2971_s3 + $0x1f8] ss:$28 sps:$4 sm:$0xff]   ;;  %v2061_v56 = vld [vmem:[%s2971_s3 + $0x1c4] ss:$28 sps:$4 sm:$0xff]  }
  0x12   :  { %1386 = vmatprep.subr.bf16.mxu1 %v2029_v24  ;;  %v2065_v57 = vld [vmem:[%s2971_s3 + $0x3bc] ss:$28 sps:$4 sm:$0xff]   ;;  %v2069_v60 = vld [vmem:[%s2971_s3 + $0x384] ss:$28 sps:$4 sm:$0xff]   ;;  %v2072_v61 = vld [vmem:[%s2971_s3 + $0x514] ss:$28 sps:$4 sm:$0xff]  }
  0x13   :  { %v2063_v58 = vld [vmem:[%s2971_s3 + $0x3b8] ss:$28 sps:$4 sm:$0xff]   ;;  %v2066_v59 = vld [vmem:[%s2971_s3 + $0x1c0] ss:$28 sps:$4 sm:$0xff]  }
  0x14   :  { %1781 = vmatmul.mubr.msk.bf16.vlgmr.msra.gmra.mxu1 %vm87_vm1, %v1992_v13  ;;  %1352 = vmatpush1.bf16.msra.mxu0 %v2012_v25  ;;  %v2067_v62 = vld [vmem:[%s2971_s3 + $0x380] ss:$28 sps:$4 sm:$0xff]  }
  0x15   :  { %1387 = vmatpush1.bf16.msra.mxu1 %v2027_v23  ;;  %1353 = vmatprep.subr.bf16.mxu0 %v2013_v28 }
  0x16   :  { %1388 = vmatprep.subr.bf16.mxu1 %v2035_v27 }
  0x18   :  { %1354 = vmatpush1.bf16.msra.mxu0 %v2015_v30 }
  0x19   :  { %1389 = vmatpush1.bf16.msra.mxu1 %v2033_v26  ;;  %1355 = vmatprep.subr.bf16.mxu0 %v2016_v32 }
  0x1a   :  { %1390 = vmatprep.subr.bf16.mxu1 %v2041_v29 }
  0x1c   :  { %1356 = vmatpush1.bf16.msra.mxu0 %v2018_v34 }
  0x1d   :  { %1391 = vmatpush1.bf16.msra.mxu1 %v2039_v31  ;;  %1357 = vmatprep.subr.bf16.mxu0 %v2019_v36 }
  0x1e   :  { %1392 = vmatprep.subr.bf16.mxu1 %v2047_v33 }
  0x20   :  { %1358 = vmatpush1.bf16.msra.mxu0 %v2021_v37 }
  0x21   :  { %1393 = vmatpush1.bf16.msra.mxu1 %v2045_v35  ;;  %1359 = vmatprep.subr.bf16.mxu0 %v2022_v38 }
  0x22   :  { %1394 = vmatprep.subr.bf16.mxu1 %v2053_v49 }
  0x24   :  { %1360 = vmatpush2.bf16.msra.mxu0 %v2024_v39 }
  0x25   :  { %1361 = vmatprep.subr.bf16.mxu0 %v2025_v40  ;;  %1395 = vmatpush1.bf16.msra.mxu1 %v2051_v50 }
  0x26   :  { %1396 = vmatprep.subr.bf16.mxu1 %v2059_v53 }
  0x28   :  { %1362 = vmatpush2.bf16.msra.mxu0 %v2030_v41 }
  0x29   :  { %1363 = vmatprep.subr.bf16.mxu0 %v2031_v42  ;;  %1397 = vmatpush1.bf16.msra.mxu1 %v2057_v54 }
  0x2a   :  { %1398 = vmatprep.subr.bf16.mxu1 %v2065_v57 }
  0x2c   :  { %1364 = vmatpush2.bf16.msra.mxu0 %v2036_v43 }
  0x2d   :  { %1365 = vmatprep.subr.bf16.mxu0 %v2037_v44  ;;  %1399 = vmatpush1.bf16.msra.mxu1 %v2063_v58 }
  0x2e   :  { %1400 = vmatprep.subr.bf16.mxu1 %v2069_v60 }
  0x30   :  { %1366 = vmatpush2.bf16.msra.mxu0 %v2042_v45 }
  0x31   :  { %1367 = vmatprep.subr.bf16.mxu0 %v2043_v46  ;;  %1401 = vmatpush1.bf16.msra.mxu1 %v2067_v62 }
  0x34   :  { %1368 = vmatpush2.bf16.msra.mxu0 %v2048_v47 }
  0x35   :  { %1369 = vmatprep.subr.bf16.mxu0 %v2049_v48 }
  0x38   :  { %1370 = vmatpush2.bf16.msra.mxu0 %v2054_v51 }
  0x39   :  { %1371 = vmatprep.subr.bf16.mxu0 %v2055_v52 }
  0x3c   :  { %1372 = vmatpush2.bf16.msra.mxu0 %v2060_v55 }
  0x3d   :  { %1373 = vmatprep.subr.bf16.mxu0 %v2061_v56 }
  0x40   :  { %1374 = vmatpush2.bf16.msra.mxu0 %v2066_v59 }
  0x41   :  { %1472 = vmatprep.subr.bf16.mxu0 %v2072_v61 }
  0x42   :  { %10 = vsyncpa [#allocation3], 0  ;;  %v2075_v63 = vld [vmem:[%s2971_s3 + $0x544] ss:$28 sps:$4 sm:$0xff]   ;;  %v2081_v1 = vld [vmem:[%s2971_s3 + $0x194] ss:$28 sps:$4 sm:$0xff]   ;;  %v32_v2 = vlaneseq }
  0x43   :  { %v2073_v0 = vld [vmem:[%s2971_s3 + $0x540] ss:$28 sps:$4 sm:$0xff]   ;;  %1416 = vmatprep.subr.bf16.mxu1 %v2075_v63  ;;  %v2070_v29 = vld [vmem:[%s2971_s3 + $0x510] ss:$28 sps:$4 sm:$0xff]   ;;  %v2076_v38 = vld [vmem:[%s2971_s3 + $0x4d8] ss:$28 sps:$4 sm:$0xff]  }
  0x44   :  { %1417 = vmatpush2.bf16.msra.mxu1 %v2073_v0  ;;  %v2517_v3 = vshrl.u32 %v32_v2, 7  ;;  %v30_v7 = vld [vmem:[%s2970_s2] sm:$0xf]  ;;  %v2078_v32 = vld [vmem:[%s2971_s3 + $0x4dc] ss:$28 sps:$4 sm:$0xff]   ;;  %vm1339_vm2 = vcmask 130048  }
  0x45   :  { %1429 = vmatprep.subr.bf16.mxu1 %v2081_v1  ;;  %v2084_v40 = vld [vmem:[%s2971_s3 + $0x4a4] ss:$28 sps:$4 sm:$0xff]   ;;  %v2079_v45 = vld [vmem:[%s2971_s3 + $0x190] ss:$28 sps:$4 sm:$0xff]   ;;  %v2087_v48 = vld [vmem:[%s2971_s3 + $0x15c] ss:$28 sps:$4 sm:$0xff]  }
  0x46   :  { %v38_v5 = vsub.s32 1, %v2517_v3  ;;  %v34_v6 = vsub.s32 0, %v2517_v3  ;;  %v46_v15 = vsub.s32 3, %v2517_v3  ;;  %v42_v18 = vsub.s32 2, %v2517_v3  ;;  %v2082_v46 = vld [vmem:[%s2971_s3 + $0x4a0] ss:$28 sps:$4 sm:$0xff]  }
  0x47   :  { %v2090_v49 = vld [vmem:[%s2971_s3 + $0x46c] ss:$28 sps:$4 sm:$0xff]   ;;  %v2085_v50 = vld [vmem:[%s2971_s3 + $0x158] ss:$28 sps:$4 sm:$0xff]   ;;  %v2093_v52 = vld [vmem:[%s2971_s3 + $0x124] ss:$28 sps:$4 sm:$0xff]  }
  0x48   :  { %v39_v9 = vrot.slane %v30_v7, %v38_v5  ;;  %v35_v10 = vrot.slane %v30_v7, %v34_v6  ;;  %v47_v24 = vrot.slane %v30_v7, %v46_v15  ;;  %v43_v26 = vrot.slane %v30_v7, %v42_v18  ;;  %v2088_v51 = vld [vmem:[%s2971_s3 + $0x468] ss:$28 sps:$4 sm:$0xff]   ;;  %v2096_v53 = vld [vmem:[%s2971_s3 + $0x434] ss:$28 sps:$4 sm:$0xff]   ;;  %v2091_v54 = vld [vmem:[%s2971_s3 + $0x120] ss:$28 sps:$4 sm:$0xff]  }
  0x49   :  { %v2094_v55 = vld [vmem:[%s2971_s3 + $0x430] ss:$28 sps:$4 sm:$0xff]   ;;  %v2102_v57 = vld [vmem:[%s2971_s3 + $0x3fc] ss:$28 sps:$4 sm:$0xff]   ;;  %v2097_v58 = vld [vmem:[%s2971_s3 + $0xe8] ss:$28 sps:$4 sm:$0xff]  }
  0x4a   :  { %v2099_v56 = vld [vmem:[%s2971_s3 + $0xec] ss:$28 sps:$4 sm:$0xff]   ;;  %v2100_v59 = vld [vmem:[%s2971_s3 + $0x3f8] ss:$28 sps:$4 sm:$0xff]   ;;  %v2108_v61 = vld [vmem:[%s2971_s3 + $0x3c4] ss:$28 sps:$4 sm:$0xff]  }
  0x4b   :  { %v2105_v60 = vld [vmem:[%s2971_s3 + $0xb4] ss:$28 sps:$4 sm:$0xff]   ;;  %v2106_v63 = vld [vmem:[%s2971_s3 + $0x3c0] ss:$28 sps:$4 sm:$0xff]   ;;  %v2114_v1 = vld [vmem:[%s2971_s3 + $0x38c] ss:$28 sps:$4 sm:$0xff]  }
  0x4c   :  { %v2103_v62 = vld [vmem:[%s2971_s3 + $0xb0] ss:$28 sps:$4 sm:$0xff]   ;;  %v2111_v0 = vld [vmem:[%s2971_s3 + $0x7c] ss:$28 sps:$4 sm:$0xff]   ;;  %v2112_v7 = vld [vmem:[%s2971_s3 + $0x388] ss:$28 sps:$4 sm:$0xff]  }
  0x4d   :  { %v2109_v2 = vld [vmem:[%s2971_s3 + $0x78] ss:$28 sps:$4 sm:$0xff]  }
  0xcc   :  { %v138_v8 = vpop.f32.mrf.mxu1 }
  0xcd   :  { %v139_v16 = vadd.f32 %v138_v8, %v35_v10  ;;  %v2117_v8 = vld [vmem:[%s2971_s3 + $0x44] ss:$28 sps:$4 sm:$0xff]  }
  0xce   :  { %v140_v11 = vpop.f32.mrf.mxu1 }
  0xcf   :  { %v141_v13 = vadd.f32 %v140_v11, %v39_v9  ;;  %v190_v25 = vmax.f32 %v139_v16, 0.0  ;;  %v2118_v11 = vld [vmem:[%s2971_s3 + $0x548] ss:$28 sps:$4 sm:$0xff]   ;;  %v2124_v16 = vld [vmem:[%s2971_s3 + $0x198] ss:$28 sps:$4 sm:$0xff]  }
  0xd0   :  { %v142_v12 = vpop.f32.mrf.mxu1 }
  0xd1   :  { %v143_v14 = vadd.f32 %v142_v12, %v35_v10  ;;  %v191_v22 = vmax.f32 %v141_v13, 0.0  ;;  %v2115_v10 = vld [vmem:[%s2971_s3 + $0x40] ss:$28 sps:$4 sm:$0xff]   ;;  %v2123_v12 = vld [vmem:[%s2971_s3 + $0xc] ss:$28 sps:$4 sm:$0xff]  }
  0xd2   :  { %v144_v17 = vpop.f32.mrf.mxu1  ;;  %v2126_v13 = vld [vmem:[%s2971_s3 + $0x19c] ss:$28 sps:$4 sm:$0xff]  }
  0xd3   :  { %v145_v19 = vadd.f32 %v144_v17, %v39_v9  ;;  %v194_v20 = vmax.f32 %v143_v14, 0.0  ;;  %v2120_v9 = vld [vmem:[%s2971_s3 + $0x54c] ss:$28 sps:$4 sm:$0xff]   ;;  %v2129_v17 = vld [vmem:[%s2971_s3 + $0x354] ss:$28 sps:$4 sm:$0xff]  }
  0xd4   :  { %v181_v21 = vpop.f32.mrf.mxu1  ;;  %v2121_v14 = vld [vmem:[%s2971_s3 + $0x8] ss:$28 sps:$4 sm:$0xff]  }
  0xd5   :  { %v195_v23 = vmax.f32 %v145_v19, 0.0  ;;  %v2539_v30 = vpack.c.bf16 %v194_v20, %v190_v25  ;;  %v182_v35 = vadd.f32 %v181_v21, %v43_v26  ;;  %v2132_v19 = vld [vmem:[%s2971_s3 + $0x164] ss:$28 sps:$4 sm:$0xff]   ;;  %v2127_v20 = vld [vmem:[%s2971_s3 + $0x350] ss:$28 sps:$4 sm:$0xff]  }
  0xd6   :  { %v183_v27 = vpop.f32.mrf.mxu1  ;;  %v2130_v21 = vld [vmem:[%s2971_s3 + $0x160] ss:$28 sps:$4 sm:$0xff]   ;;  %v2136_v25 = vld [vmem:[%s2971_s3 + $0x128] ss:$28 sps:$4 sm:$0xff]  }
  0xd7   :  { %v2534_v28 = vpack.c.bf16 %v195_v23, %v191_v22  ;;  %v184_v33 = vadd.f32 %v183_v27, %v47_v24  ;;  %v192_v43 = vmax.f32 %v182_v35, 0.0  ;;  %v2135_v22 = vld [vmem:[%s2971_s3 + $0x31c] ss:$28 sps:$4 sm:$0xff]   ;;  %v2138_v23 = vld [vmem:[%s2971_s3 + $0x12c] ss:$28 sps:$4 sm:$0xff]  }
  0xd8   :  { %v185_v31 = vpop.f32.mrf.mxu1  ;;  %v2144_v27 = vld [vmem:[%s2971_s3 + $0xf4] ss:$28 sps:$4 sm:$0xff]  }
  0xd9   :  { %v186_v34 = vadd.f32 %v185_v31, %v43_v26  ;;  %1375 = vmatprep.mubr.bf16.mxu0 %v2534_v28  ;;  %v193_v41 = vmax.f32 %v184_v33, 0.0  ;;  %v2141_v26 = vld [vmem:[%s2971_s3 + $0x2e4] ss:$28 sps:$4 sm:$0xff]   ;;  %v2142_v31 = vld [vmem:[%s2971_s3 + $0xf0] ss:$28 sps:$4 sm:$0xff]  }
  0xda   :  { %v187_v36 = vpop.f32.mrf.mxu1  ;;  %1376 = vmatmul.mubr.bf16.vlgmr.msra.gmra.mxu0 %v2539_v30  ;;  %v2150_v33 = vld [vmem:[%s2971_s3 + $0xbc] ss:$28 sps:$4 sm:$0xff]  }
  0xdb   :  { %v188_v37 = vadd.f32 %v187_v36, %v47_v24  ;;  %1473 = vmatpush1.bf16.msra.mxu0 %v2070_v29  ;;  %v196_v39 = vmax.f32 %v186_v34, 0.0  ;;  %v2133_v24 = vld [vmem:[%s2971_s3 + $0x318] ss:$28 sps:$4 sm:$0xff]   ;;  %v2139_v29 = vld [vmem:[%s2971_s3 + $0x2e0] ss:$28 sps:$4 sm:$0xff]  }
  0xdc   :  { %1474 = vmatprep.subr.bf16.mxu0 %v2078_v32  ;;  %v2147_v32 = vld [vmem:[%s2971_s3 + $0x2ac] ss:$28 sps:$4 sm:$0xff]   ;;  %v2148_v35 = vld [vmem:[%s2971_s3 + $0xb8] ss:$28 sps:$4 sm:$0xff]  }
  0xdd   :  { %v197_v42 = vmax.f32 %v188_v37, 0.0  ;;  %v2560_v47 = vpack.c.bf16 %v196_v39, %v192_v43  ;;  %v2145_v34 = vld [vmem:[%s2971_s3 + $0x2a8] ss:$28 sps:$4 sm:$0xff]   ;;  %v2153_v36 = vld [vmem:[%s2971_s3 + $0x274] ss:$28 sps:$4 sm:$0xff]  }
  0xde   :  { %v2156_v37 = vld [vmem:[%s2971_s3 + $0x84] ss:$28 sps:$4 sm:$0xff]  }
  0xdf   :  { %v2552_v44 = vpack.c.bf16 %v197_v42, %v193_v41  ;;  %1475 = vmatpush1.bf16.msra.mxu0 %v2076_v38  ;;  %v2151_v38 = vld [vmem:[%s2971_s3 + $0x270] ss:$28 sps:$4 sm:$0xff]   ;;  %v2154_v39 = vld [vmem:[%s2971_s3 + $0x80] ss:$28 sps:$4 sm:$0xff]   ;;  %v2157_v42 = vld [vmem:[%s2971_s3 + $0x238] ss:$28 sps:$4 sm:$0xff]  }
  0xe0   :  { %1476 = vmatprep.subr.bf16.mxu0 %v2084_v40  ;;  %v2159_v40 = vld [vmem:[%s2971_s3 + $0x23c] ss:$28 sps:$4 sm:$0xff]   ;;  %v2162_v41 = vld [vmem:[%s2971_s3 + $0x4c] ss:$28 sps:$4 sm:$0xff]  }
  0xe1   :  { %1957 = vmatprep.mubr.msk.bf16.mxu1 %vm1339_vm2, %v2552_v44  ;;  %1958 = vmatprep.mubr.msk.bf16.mxu0 %vm1339_vm2, %v2552_v44  ;;  %v2160_v43 = vld [vmem:[%s2971_s3 + $0x48] ss:$28 sps:$4 sm:$0xff]  }
  0xe2   :  { %1419 = vmatmul.mubr.bf16.vlgmr.msra.gmra.mxu1 %v2560_v47 }
  0xe3   :  { %1430 = vmatpush1.bf16.msra.mxu1 %v2079_v45  ;;  %1477 = vmatpush1.bf16.msra.mxu0 %v2082_v46  ;;  %v2165_v45 = vld [vmem:[%s2971_s3 + $0x204] ss:$28 sps:$4 sm:$0xff]   ;;  %v2168_v46 = vld [vmem:[%s2971_s3 + $0x14] ss:$28 sps:$4 sm:$0xff]  }
  0xe4   :  { %1461 = vmatprep.mubr.bf16.mxu1 %v2534_v28  ;;  %1431 = vmatprep.subr.bf16.mxu1 %v2087_v48  ;;  %v2163_v48 = vld [vmem:[%s2971_s3 + $0x200] ss:$28 sps:$4 sm:$0xff]  }
  0xe5   :  { %1478 = vmatprep.subr.bf16.mxu0 %v2090_v49  ;;  %v2166_v49 = vld [vmem:[%s2971_s3 + $0x10] ss:$28 sps:$4 sm:$0xff]  }
  0xe7   :  { %1432 = vmatpush1.bf16.msra.mxu1 %v2085_v50  ;;  %1479 = vmatpush1.bf16.msra.mxu0 %v2088_v51  ;;  %v2171_v50 = vld [vmem:[%s2971_s3 + $0x1cc] ss:$28 sps:$4 sm:$0xff]   ;;  %v2174_v51 = vld [vmem:[%s2971_s3 + $0x35c] ss:$28 sps:$4 sm:$0xff]  }
  0xe8   :  { %1433 = vmatprep.subr.bf16.mxu1 %v2093_v52  ;;  %1480 = vmatprep.subr.bf16.mxu0 %v2096_v53  ;;  %v2169_v52 = vld [vmem:[%s2971_s3 + $0x1c8] ss:$28 sps:$4 sm:$0xff]   ;;  %v2172_v53 = vld [vmem:[%s2971_s3 + $0x358] ss:$28 sps:$4 sm:$0xff]  }
  0xeb   :  { %1434 = vmatpush1.bf16.msra.mxu1 %v2091_v54  ;;  %1481 = vmatpush1.bf16.msra.mxu0 %v2094_v55  ;;  %v2177_v54 = vld [vmem:[%s2971_s3 + $0x324] ss:$28 sps:$4 sm:$0xff]   ;;  %v2180_v55 = vld [vmem:[%s2971_s3 + $0x51c] ss:$28 sps:$4 sm:$0xff]  }
  0xec   :  { %1435 = vmatprep.subr.bf16.mxu1 %v2099_v56  ;;  %1482 = vmatprep.subr.bf16.mxu0 %v2102_v57  ;;  %v2175_v56 = vld [vmem:[%s2971_s3 + $0x320] ss:$28 sps:$4 sm:$0xff]   ;;  %v2178_v57 = vld [vmem:[%s2971_s3 + $0x518] ss:$28 sps:$4 sm:$0xff]  }
  0xef   :  { %1436 = vmatpush1.bf16.msra.mxu1 %v2097_v58  ;;  %1483 = vmatpush1.bf16.msra.mxu0 %v2100_v59  ;;  %v2183_v58 = vld [vmem:[%s2971_s3 + $0x2ec] ss:$28 sps:$4 sm:$0xff]   ;;  %v2186_v59 = vld [vmem:[%s2971_s3 + $0x4e4] ss:$28 sps:$4 sm:$0xff]  }
  0xf0   :  { %1437 = vmatprep.subr.bf16.mxu1 %v2105_v60  ;;  %1484 = vmatprep.subr.bf16.mxu0 %v2108_v61  ;;  %v2181_v60 = vld [vmem:[%s2971_s3 + $0x2e8] ss:$28 sps:$4 sm:$0xff]   ;;  %v2184_v61 = vld [vmem:[%s2971_s3 + $0x4e0] ss:$28 sps:$4 sm:$0xff]  }
  0xf3   :  { %1438 = vmatpush1.bf16.msra.mxu1 %v2103_v62  ;;  %1485 = vmatpush1.bf16.msra.mxu0 %v2106_v63  ;;  %v2189_v62 = vld [vmem:[%s2971_s3 + $0x2b4] ss:$28 sps:$4 sm:$0xff]   ;;  %v2192_v63 = vld [vmem:[%s2971_s3 + $0x4ac] ss:$28 sps:$4 sm:$0xff]  }
  0xf4   :  { %1439 = vmatprep.subr.bf16.mxu1 %v2111_v0  ;;  %1486 = vmatprep.subr.bf16.mxu0 %v2114_v1  ;;  %v2187_v0 = vld [vmem:[%s2971_s3 + $0x2b0] ss:$28 sps:$4 sm:$0xff]   ;;  %v2190_v1 = vld [vmem:[%s2971_s3 + $0x4a8] ss:$28 sps:$4 sm:$0xff]  }
  0xf7   :  { %1440 = vmatpush1.bf16.msra.mxu1 %v2109_v2  ;;  %1487 = vmatpush1.bf16.msra.mxu0 %v2112_v7  ;;  %v2195_v2 = vld [vmem:[%s2971_s3 + $0x27c] ss:$28 sps:$4 sm:$0xff]   ;;  %v2198_v7 = vld [vmem:[%s2971_s3 + $0x474] ss:$28 sps:$4 sm:$0xff]  }
  0xf8   :  { %1441 = vmatprep.subr.bf16.mxu1 %v2117_v8  ;;  %1502 = vmatprep.subr.bf16.mxu0 %v2120_v9  ;;  %v2193_v8 = vld [vmem:[%s2971_s3 + $0x278] ss:$28 sps:$4 sm:$0xff]   ;;  %v2196_v9 = vld [vmem:[%s2971_s3 + $0x470] ss:$28 sps:$4 sm:$0xff]  }
  0xfb   :  { %1442 = vmatpush1.bf16.msra.mxu1 %v2115_v10  ;;  %1503 = vmatpush2.bf16.msra.mxu0 %v2118_v11  ;;  %v2201_v10 = vld [vmem:[%s2971_s3 + $0x244] ss:$28 sps:$4 sm:$0xff]   ;;  %v2204_v11 = vld [vmem:[%s2971_s3 + $0x43c] ss:$28 sps:$4 sm:$0xff]  }
  0xfc   :  { %1443 = vmatprep.subr.bf16.mxu1 %v2123_v12  ;;  %1515 = vmatprep.subr.bf16.mxu0 %v2126_v13  ;;  %v2199_v12 = vld [vmem:[%s2971_s3 + $0x240] ss:$28 sps:$4 sm:$0xff]   ;;  %v2202_v13 = vld [vmem:[%s2971_s3 + $0x438] ss:$28 sps:$4 sm:$0xff]  }
  0xfe   :  { %1505 = vmatmul.mubr.bf16.vlgmr.msra.gmra.mxu0 %v2560_v47 }
  0xff   :  { %1444 = vmatpush1.bf16.msra.mxu1 %v2121_v14  ;;  %1516 = vmatpush1.bf16.msra.mxu0 %v2124_v16  ;;  %v2207_v14 = vld [vmem:[%s2971_s3 + $0x20c] ss:$28 sps:$4 sm:$0xff]   ;;  %v2210_v16 = vld [vmem:[%s2971_s3 + $0x404] ss:$28 sps:$4 sm:$0xff]  }
 0x100   :  { %1547 = vmatprep.mubr.bf16.mxu0 %v2534_v28  ;;  %1445 = vmatprep.subr.bf16.mxu1 %v2129_v17  ;;  %v2205_v17 = vld [vmem:[%s2971_s3 + $0x208] ss:$28 sps:$4 sm:$0xff]  }
 0x101   :  { %1517 = vmatprep.subr.bf16.mxu0 %v2132_v19  ;;  %v2208_v19 = vld [vmem:[%s2971_s3 + $0x400] ss:$28 sps:$4 sm:$0xff]  }
 0x103   :  { %1446 = vmatpush2.bf16.msra.mxu1 %v2127_v20  ;;  %1518 = vmatpush1.bf16.msra.mxu0 %v2130_v21  ;;  %v2213_v20 = vld [vmem:[%s2971_s3 + $0x1d4] ss:$28 sps:$4 sm:$0xff]   ;;  %v2216_v21 = vld [vmem:[%s2971_s3 + $0x3cc] ss:$28 sps:$4 sm:$0xff]  }
 0x104   :  { %1447 = vmatprep.subr.bf16.mxu1 %v2135_v22  ;;  %1519 = vmatprep.subr.bf16.mxu0 %v2138_v23  ;;  %v2211_v22 = vld [vmem:[%s2971_s3 + $0x1d0] ss:$28 sps:$4 sm:$0xff]   ;;  %v2214_v23 = vld [vmem:[%s2971_s3 + $0x3c8] ss:$28 sps:$4 sm:$0xff]  }
 0x107   :  { %1448 = vmatpush2.bf16.msra.mxu1 %v2133_v24  ;;  %1520 = vmatpush1.bf16.msra.mxu0 %v2136_v25  ;;  %v2219_v24 = vld [vmem:[%s2971_s3 + $0x394] ss:$28 sps:$4 sm:$0xff]  }
 0x108   :  { %1449 = vmatprep.subr.bf16.mxu1 %v2141_v26  ;;  %1521 = vmatprep.subr.bf16.mxu0 %v2144_v27  ;;  %v2217_v25 = vld [vmem:[%s2971_s3 + $0x390] ss:$28 sps:$4 sm:$0xff]   ;;  %v2220_v26 = vld [vmem:[%s2971_s3 + $0x520] ss:$28 sps:$4 sm:$0xff]  }
 0x109   :  { %v2223_v27 = vld [vmem:[%s2971_s3 + $0x554] ss:$28 sps:$4 sm:$0xff]  }
 0x10b   :  { %1450 = vmatpush2.bf16.msra.mxu1 %v2139_v29  ;;  %1522 = vmatpush1.bf16.msra.mxu0 %v2142_v31  ;;  %v2221_v29 = vld [vmem:[%s2971_s3 + $0x550] ss:$28 sps:$4 sm:$0xff]   ;;  %v2224_v31 = vld [vmem:[%s2971_s3 + $0x4e8] ss:$28 sps:$4 sm:$0xff]  }
 0x10c   :  { %1451 = vmatprep.subr.bf16.mxu1 %v2147_v32  ;;  %1523 = vmatprep.subr.bf16.mxu0 %v2150_v33  ;;  %v2225_v32 = vld [vmem:[%s2971_s3 + $0x360] ss:$28 sps:$4 sm:$0xff]  }
 0x10d   :  { %v2226_v33 = vld [vmem:[%s2971_s3 + $0x1a0] ss:$28 sps:$4 sm:$0xff]  }
 0x10f   :  { %1452 = vmatpush2.bf16.msra.mxu1 %v2145_v34  ;;  %1524 = vmatpush1.bf16.msra.mxu0 %v2148_v35  ;;  %v2228_v34 = vld [vmem:[%s2971_s3 + $0x328] ss:$28 sps:$4 sm:$0xff]  }
 0x110   :  { %1453 = vmatprep.subr.bf16.mxu1 %v2153_v36  ;;  %1525 = vmatprep.subr.bf16.mxu0 %v2156_v37  ;;  %v2229_v35 = vld [vmem:[%s2971_s3 + $0x168] ss:$28 sps:$4 sm:$0xff]   ;;  %v2230_v36 = vld [vmem:[%s2971_s3 + $0x478] ss:$28 sps:$4 sm:$0xff]   ;;  %v2231_v37 = vld [vmem:[%s2971_s3 + $0x2f0] ss:$28 sps:$4 sm:$0xff]  }
 0x113   :  { %1454 = vmatpush2.bf16.msra.mxu1 %v2151_v38  ;;  %1526 = vmatpush1.bf16.msra.mxu0 %v2154_v39  ;;  %v2233_v38 = vld [vmem:[%s2971_s3 + $0x440] ss:$28 sps:$4 sm:$0xff]   ;;  %v2234_v39 = vld [vmem:[%s2971_s3 + $0x2b8] ss:$28 sps:$4 sm:$0xff]  }
 0x114   :  { %1455 = vmatprep.subr.bf16.mxu1 %v2159_v40  ;;  %1527 = vmatprep.subr.bf16.mxu0 %v2162_v41  ;;  %v2235_v40 = vld [vmem:[%s2971_s3 + $0xf8] ss:$28 sps:$4 sm:$0xff]   ;;  %v2236_v41 = vld [vmem:[%s2971_s3 + $0x408] ss:$28 sps:$4 sm:$0xff]  }
 0x117   :  { %1456 = vmatpush2.bf16.msra.mxu1 %v2157_v42  ;;  %1528 = vmatpush1.bf16.msra.mxu0 %v2160_v43  ;;  %v2237_v42 = vld [vmem:[%s2971_s3 + $0x280] ss:$28 sps:$4 sm:$0xff]  }
 0x118   :  { %1457 = vmatprep.subr.bf16.mxu1 %v2165_v45  ;;  %1529 = vmatprep.subr.bf16.mxu0 %v2168_v46  ;;  %v2238_v43 = vld [vmem:[%s2971_s3 + $0xc0] ss:$28 sps:$4 sm:$0xff]   ;;  %v2239_v45 = vld [vmem:[%s2971_s3 + $0x3d0] ss:$28 sps:$4 sm:$0xff]   ;;  %v2240_v46 = vld [vmem:[%s2971_s3 + $0x248] ss:$28 sps:$4 sm:$0xff]  }
 0x11b   :  { %1458 = vmatpush2.bf16.msra.mxu1 %v2163_v48  ;;  %1530 = vmatpush1.bf16.msra.mxu0 %v2166_v49  ;;  %v2241_v48 = vld [vmem:[%s2971_s3 + $0x88] ss:$28 sps:$4 sm:$0xff]   ;;  %v2242_v49 = vld [vmem:[%s2971_s3 + $0x398] ss:$28 sps:$4 sm:$0xff]  }
 0x11c   :  { %1459 = vmatprep.subr.bf16.mxu1 %v2171_v50  ;;  %1531 = vmatprep.subr.bf16.mxu0 %v2174_v51  ;;  %v2243_v50 = vld [vmem:[%s2971_s3 + $0x210] ss:$28 sps:$4 sm:$0xff]  }
 0x11d   :  { %v2244_v51 = vld [vmem:[%s2971_s3 + $0x50] ss:$28 sps:$4 sm:$0xff]  }
 0x11f   :  { %1460 = vmatpush2.bf16.msra.mxu1 %v2169_v52  ;;  %1532 = vmatpush2.bf16.msra.mxu0 %v2172_v53  ;;  %v2245_v52 = vld [vmem:[%s2971_s3 + $0x558] ss:$28 sps:$4 sm:$0xff]  }
 0x120   :  { %1533 = vmatprep.subr.bf16.mxu0 %v2177_v54  ;;  %1558 = vmatprep.subr.bf16.mxu1 %v2180_v55  ;;  %v2246_v53 = vld [vmem:[%s2971_s3 + $0x1d8] ss:$28 sps:$4 sm:$0xff]   ;;  %v2943_v55 = vld [vmem:[%s2972_s4] sm:$0x7f] }
 0x121   :  { %v2247_v54 = vld [vmem:[%s2971_s3 + $0x18] ss:$28 sps:$4 sm:$0xff]  }
 0x122   :  { %1462 = vmatmul.mubr.bf16.vlgmr.msra.gmra.mxu1 %v2539_v30 }
 0x123   :  { %1534 = vmatpush2.bf16.msra.mxu0 %v2175_v56  ;;  %1559 = vmatpush1.bf16.msra.mxu1 %v2178_v57 }
 0x124   :  { %1959 = vmatprep.mubr.msk.bf16.mxu1 %vm1339_vm2, %v2552_v44  ;;  %1535 = vmatprep.subr.bf16.mxu0 %v2183_v58  ;;  %v411_v58 = vrot.slane %v2943_v55, %v38_v5 }
 0x125   :  { %1560 = vmatprep.subr.bf16.mxu1 %v2186_v59 }
 0x127   :  { %1536 = vmatpush2.bf16.msra.mxu0 %v2181_v60  ;;  %1561 = vmatpush1.bf16.msra.mxu1 %v2184_v61 }
 0x128   :  { %1537 = vmatprep.subr.bf16.mxu0 %v2189_v62  ;;  %1562 = vmatprep.subr.bf16.mxu1 %v2192_v63 }
 0x12b   :  { %1538 = vmatpush2.bf16.msra.mxu0 %v2187_v0  ;;  %1563 = vmatpush1.bf16.msra.mxu1 %v2190_v1 }
 0x12c   :  { %1539 = vmatprep.subr.bf16.mxu0 %v2195_v2  ;;  %1564 = vmatprep.subr.bf16.mxu1 %v2198_v7 }
 0x12f   :  { %1540 = vmatpush2.bf16.msra.mxu0 %v2193_v8  ;;  %1565 = vmatpush1.bf16.msra.mxu1 %v2196_v9 }
 0x130   :  { %1541 = vmatprep.subr.bf16.mxu0 %v2201_v10  ;;  %1566 = vmatprep.subr.bf16.mxu1 %v2204_v11 }
 0x133   :  { %1542 = vmatpush2.bf16.msra.mxu0 %v2199_v12  ;;  %1567 = vmatpush1.bf16.msra.mxu1 %v2202_v13 }
 0x134   :  { %1543 = vmatprep.subr.bf16.mxu0 %v2207_v14  ;;  %1568 = vmatprep.subr.bf16.mxu1 %v2210_v16 }
 0x137   :  { %1544 = vmatpush2.bf16.msra.mxu0 %v2205_v17  ;;  %1569 = vmatpush1.bf16.msra.mxu1 %v2208_v19 }
 0x138   :  { %1545 = vmatprep.subr.bf16.mxu0 %v2213_v20  ;;  %1570 = vmatprep.subr.bf16.mxu1 %v2216_v21 }
 0x13b   :  { %1546 = vmatpush2.bf16.msra.mxu0 %v2211_v22  ;;  %1571 = vmatpush1.bf16.msra.mxu1 %v2214_v23 }
 0x13c   :  { %1572 = vmatprep.subr.bf16.mxu1 %v2219_v24  ;;  %1642 = vmatprep.subr.bf16.mxu0 %v2298_v4 }
 0x13e   :  { %1548 = vmatmul.mubr.bf16.vlgmr.msra.gmra.mxu0 %v2539_v30 }
 0x13f   :  { %1573 = vmatpush1.bf16.msra.mxu1 %v2217_v25  ;;  %1643 = vmatpush1.bf16.msra.mxu0 %v2220_v26 }
 0x140   :  { %1960 = vmatprep.mubr.msk.bf16.mxu0 %vm1339_vm2, %v2552_v44  ;;  %1588 = vmatprep.subr.bf16.mxu1 %v2223_v27  ;;  %v2227_v44 = vld [vmem:[%s2971_s3 + $0x4b0] ss:$28 sps:$4 sm:$0xff]  }
 0x141   :  { %1644 = vmatprep.subr.bf16.mxu0 %v2298_v4 }
 0x143   :  { %1589 = vmatpush2.bf16.msra.mxu1 %v2221_v29  ;;  %1645 = vmatpush1.bf16.msra.mxu0 %v2224_v31  ;;  %v415_v29 = vrot.slane %v2943_v55, %v42_v18  ;;  %v419_v31 = vrot.slane %v2943_v55, %v46_v15 }
 0x144   :  { %1961 = vmatprep.subr.bf16.mxu1 %v2225_v32  ;;  %1646 = vmatprep.subr.bf16.mxu0 %v2298_v4 }
 0x146   :  { %1591 = vmatmul.mubr.bf16.vlgmr.msra.gmra.mxu1 %v2560_v47 }
 0x147   :  { %1962 = vmatpush3.bf16.msra.mxu1 %v2226_v33  ;;  %1633 = vmatprep.mubr.bf16.mxu1 %v2534_v28  ;;  %v2232_v28 = vld [vmem:[%s2971_s3 + $0x130] ss:$28 sps:$4 sm:$0xff]   ;;  %s2299_s3 = smov [#allocation2]  }
 0x148   :  { %1647 = vmatpush1.bf16.msra.mxu0 %v2227_v44  ;;  %1963 = vmatprep.subr.bf16.mxu1 %v2228_v34  ;;  %s1758_s4 = sshll.u32 %s2299_s3, 4  ;;  %s1759_s4 = int_to_ptr.vmem [resolvable:$true] %s1758_s4 }
 0x149   :  { %1648 = vmatprep.subr.bf16.mxu0 %v2298_v4  ;;  %s2276_s26 = scalar_lea.vmem %s1759_s4, 1792  ;;  %p2281_p1 = scmp.lt.s32.totalorder %s1759_s4, %s1759_s4 }
 0x14a   :  { %p2277_p0 = scmp.ne.s32.totalorder %s1759_s4, %s2276_s26  ;;  %p2282_p2 = scmp.lt.s32.totalorder %s2276_s26, %s2276_s26 }
 0x14b   :  { %1964 = vmatpush3.bf16.msra.mxu1 %v2229_v35 }
 0x14c   :  { %1649 = vmatpush1.bf16.msra.mxu0 %v2230_v36  ;;  %1965 = vmatprep.subr.bf16.mxu1 %v2231_v37  ;;  %p2283_p3 = por %p2282_p2, %p2281_p1 }
 0x14d   :  { %1650 = vmatprep.subr.bf16.mxu0 %v2298_v4 }
 0x14e   :  { %p2284_p4 = pnand %p2283_p3, %p2277_p0 }
 0x14f   :  { %1966 = vmatpush3.bf16.msra.mxu1 %v2232_v28 }
 0x150   :  { %1651 = vmatpush1.bf16.msra.mxu0 %v2233_v38  ;;  %1967 = vmatprep.subr.bf16.mxu1 %v2234_v39 }
 0x151   :  { %1652 = vmatprep.subr.bf16.mxu0 %v2298_v4 }
 0x153   :  { %1968 = vmatpush3.bf16.msra.mxu1 %v2235_v40 }
 0x154   :  { %1653 = vmatpush1.bf16.msra.mxu0 %v2236_v41  ;;  %1969 = vmatprep.subr.bf16.mxu1 %v2237_v42 }
 0x155   :  { %1654 = vmatprep.subr.bf16.mxu0 %v2298_v4 }
 0x157   :  { %1970 = vmatpush3.bf16.msra.mxu1 %v2238_v43 }
 0x158   :  { %1655 = vmatpush1.bf16.msra.mxu0 %v2239_v45  ;;  %1971 = vmatprep.subr.bf16.mxu1 %v2240_v46 }
 0x159   :  { %1656 = vmatprep.subr.bf16.mxu0 %v2298_v4 }
 0x15b   :  { %1972 = vmatpush3.bf16.msra.mxu1 %v2241_v48 }
 0x15c   :  { %1657 = vmatpush1.bf16.msra.mxu0 %v2242_v49  ;;  %1973 = vmatprep.subr.bf16.mxu1 %v2243_v50 }
 0x15d   :  { %1672 = vmatprep.subr.bf16.mxu0 %v2298_v4  ;;  %v407_v4 = vrot.slane %v2943_v55, %v34_v6 }
 0x15f   :  { %1974 = vmatpush3.bf16.msra.mxu1 %v2244_v51 }
 0x160   :  { %1673 = vmatpush2.bf16.msra.mxu0 %v2245_v52  ;;  %1975 = vmatprep.subr.bf16.mxu1 %v2246_v53 }
 0x163   :  { %1675 = vmatmul.mubr.bf16.vlgmr.msra.gmra.mxu0 %v2560_v47  ;;  %1976 = vmatpush3.bf16.msra.mxu1 %v2247_v54 }
 0x166   :  { %1634 = vmatmul.mubr.bf16.vlgmr.msra.gmra.mxu1 %v2539_v30 }
 0x19a   :  { %v1377_v56 = vpop.f32.mrf.mxu0 }
 0x19b   :  { %v1378_v47 = vadd.f32 %v1377_v56, %v407_v4 }
 0x19c   :  { %v1379_v57 = vpop.f32.mrf.mxu0 }
 0x19d   :  { %v1380_v61 = vadd.f32 %v1379_v57, %v411_v58 }
 0x19e   :  { %v1381_v59 = vpop.f32.mrf.mxu0 }
 0x19f   :  { %v1382_v0 = vadd.f32 %v1381_v59, %v407_v4 }
 0x1a0   :  { %v1383_v62 = vpop.f32.mrf.mxu0 }
 0x1a1   :  { %v1384_v8 = vadd.f32 %v1383_v62, %v411_v58 }
 0x1a2   :  { %v1420_v60 = vpop.f32.mrf.mxu1 }
 0x1a3   :  { %v1421_v30 = vadd.f32 %v1420_v60, %v1378_v47  ;;  %v422_v47 = vsub.s32 4, %v2517_v3 }
 0x1a4   :  { %v1422_v63 = vpop.f32.mrf.mxu1 }
 0x1a5   :  { %v1683_v1 = vmul.f32 0.5, %v1421_v30  ;;  %v1423_v2 = vadd.f32 %v1422_v63, %v1380_v61  ;;  %v426_v30 = vsub.s32 5, %v2517_v3  ;;  %v423_v63 = vrot.slane %v2943_v55, %v422_v47 }
 0x1a6   :  { %v1424_v7 = vpop.f32.mrf.mxu1 }
 0x1a7   :  { %2248 = vtanh.f32 %v1683_v1  ;;  %v1684_v9 = vmul.f32 0.5, %v1423_v2  ;;  %v1425_v10 = vadd.f32 %v1424_v7, %v1382_v0  ;;  %v427_v0 = vrot.slane %v2943_v55, %v426_v30 }
 0x1a8   :  { %v1426_v6 = vpop.f32.mrf.mxu1 }
 0x1a9   :  { %2250 = vtanh.f32 %v1684_v9  ;;  %v1690_v11 = vmul.f32 0.5, %v1425_v10  ;;  %v1427_v12 = vadd.f32 %v1426_v6, %v1384_v8 }
 0x1ab   :  { %2252 = vtanh.f32 %v1690_v11  ;;  %v1691_v5 = vmul.f32 0.5, %v1427_v12 }
 0x1ad   :  { %2254 = vtanh.f32 %v1691_v5 }
 0x1b4   :  { %v2249_v13 = vpop.eup %2248 }
 0x1b5   :  { %v1711_v14 = vadd.f32 1.0, %v2249_v13 }
 0x1b6   :  { %v2251_v16 = vpop.eup %2250 }
 0x1b7   :  { %v1725_v17 = vmul.f32 0.5, %v1711_v14  ;;  %v1712_v19 = vadd.f32 1.0, %v2251_v16 }
 0x1b8   :  { %v2253_v20 = vpop.eup %2252 }
 0x1b9   :  { %1739 = vst [vmem:[#allocation2] sm:$0xff] %v1725_v17  ;;  %v1726_v21 = vmul.f32 0.5, %v1712_v19  ;;  %v1718_v22 = vadd.f32 1.0, %v2253_v20 }
 0x1ba   :  { %v2255_v23 = vpop.eup %2254 }
 0x1bb   :  { %1740 = vst [vmem:[#allocation2 + $0x8] sm:$0xff] %v1726_v21  ;;  %v1732_v24 = vmul.f32 0.5, %v1718_v22  ;;  %v1719_v25 = vadd.f32 1.0, %v2255_v23 }
 0x1bd   :  { %1746 = vst [vmem:[#allocation2 + $0x38] sm:$0xff] %v1732_v24  ;;  %v1733_v26 = vmul.f32 0.5, %v1719_v25 }
 0x1be   :  { %v1506_v27 = vpop.f32.mrf.mxu0 }
 0x1bf   :  { %1747 = vst [vmem:[#allocation2 + $0x40] sm:$0xff] %v1733_v26 }
 0x1c0   :  { %v1508_v32 = vpop.f32.mrf.mxu0 }
 0x1c2   :  { %v1510_v37 = vpop.f32.mrf.mxu0 }
 0x1c4   :  { %v1512_v45 = vpop.f32.mrf.mxu0 }
 0x1e2   :  { %v1463_v33 = vpop.f32.mrf.mxu1 }
 0x1e3   :  { %v1464_v44 = vadd.f32 %v1463_v33, %v415_v29 }
 0x1e4   :  { %v1465_v34 = vpop.f32.mrf.mxu1 }
 0x1e5   :  { %v1507_v35 = vadd.f32 %v1506_v27, %v1464_v44  ;;  %v1466_v36 = vadd.f32 %v1465_v34, %v419_v31 }
 0x1e6   :  { %v1467_v28 = vpop.f32.mrf.mxu1 }
 0x1e7   :  { %v1685_v38 = vmul.f32 0.5, %v1507_v35  ;;  %v1509_v39 = vadd.f32 %v1508_v32, %v1466_v36  ;;  %v1468_v40 = vadd.f32 %v1467_v28, %v415_v29 }
 0x1e8   :  { %v1469_v41 = vpop.f32.mrf.mxu1 }
 0x1e9   :  { %2256 = vtanh.f32 %v1685_v38  ;;  %v1686_v42 = vmul.f32 0.5, %v1509_v39  ;;  %v1511_v43 = vadd.f32 %v1510_v37, %v1468_v40  ;;  %v1470_v18 = vadd.f32 %v1469_v41, %v419_v31 }
 0x1ea   :  { %v430_v37 = vsub.s32 6, %v2517_v3 }
 0x1eb   :  { %2258 = vtanh.f32 %v1686_v42  ;;  %v1692_v46 = vmul.f32 0.5, %v1511_v43  ;;  %v1513_v15 = vadd.f32 %v1512_v45, %v1470_v18 }
 0x1ec   :  { %v431_v40 = vrot.slane %v2943_v55, %v430_v37 }
 0x1ed   :  { %2260 = vtanh.f32 %v1692_v46  ;;  %v1693_v48 = vmul.f32 0.5, %v1513_v15 }
 0x1ef   :  { %2262 = vtanh.f32 %v1693_v48 }
 0x1f6   :  { %v2257_v49 = vpop.eup %2256 }
 0x1f7   :  { %v1713_v50 = vadd.f32 1.0, %v2257_v49 }
 0x1f8   :  { %v2259_v51 = vpop.eup %2258 }
 0x1f9   :  { %v1727_v52 = vmul.f32 0.5, %v1713_v50  ;;  %v1714_v53 = vadd.f32 1.0, %v2259_v51 }
 0x1fa   :  { %v2261_v54 = vpop.eup %2260 }
 0x1fb   :  { %1741 = vst [vmem:[#allocation2 + $0x10] sm:$0xff] %v1727_v52  ;;  %v1728_v56 = vmul.f32 0.5, %v1714_v53  ;;  %v1720_v57 = vadd.f32 1.0, %v2261_v54 }
 0x1fc   :  { %v2263_v4 = vpop.eup %2262 }
 0x1fd   :  { %1742 = vst [vmem:[#allocation2 + $0x18] sm:$0xff] %v1728_v56  ;;  %v1734_v58 = vmul.f32 0.5, %v1720_v57  ;;  %v1721_v59 = vadd.f32 1.0, %v2263_v4 }
 0x1fe   :  { %v1549_v60 = vpop.f32.mrf.mxu0 }
 0x1ff   :  { %1748 = vst [vmem:[#allocation2 + $0x48] sm:$0xff] %v1734_v58  ;;  %v1735_v61 = vmul.f32 0.5, %v1721_v59  ;;  %v1550_v2 = vadd.f32 %v1549_v60, %v423_v63 }
 0x200   :  { %v1551_v62 = vpop.f32.mrf.mxu0 }
 0x201   :  { %1749 = vst [vmem:[#allocation2 + $0x50] sm:$0xff] %v1735_v61  ;;  %v1552_v8 = vadd.f32 %v1551_v62, %v427_v0 }
 0x202   :  { %v1553_v1 = vpop.f32.mrf.mxu0 }
 0x203   :  { %v1554_v11 = vadd.f32 %v1553_v1, %v423_v63 }
 0x204   :  { %v1555_v10 = vpop.f32.mrf.mxu0 }
 0x205   :  { %v1556_v14 = vadd.f32 %v1555_v10, %v427_v0 }
 0x206   :  { %v1592_v7 = vpop.f32.mrf.mxu1 }
 0x207   :  { %v1593_v9 = vadd.f32 %v1592_v7, %v1550_v2 }
 0x208   :  { %v1594_v6 = vpop.f32.mrf.mxu1 }
 0x209   :  { %v1687_v12 = vmul.f32 0.5, %v1593_v9  ;;  %v1595_v5 = vadd.f32 %v1594_v6, %v1552_v8 }
 0x20a   :  { %v1596_v13 = vpop.f32.mrf.mxu1 }
 0x20b   :  { %2264 = vtanh.f32 %v1687_v12  ;;  %v1688_v16 = vmul.f32 0.5, %v1595_v5  ;;  %v1597_v17 = vadd.f32 %v1596_v13, %v1554_v11 }
 0x20c   :  { %v1598_v19 = vpop.f32.mrf.mxu1 }
 0x20d   :  { %2266 = vtanh.f32 %v1688_v16  ;;  %v1694_v20 = vmul.f32 0.5, %v1597_v17  ;;  %v1599_v21 = vadd.f32 %v1598_v19, %v1556_v14 }
 0x20f   :  { %2268 = vtanh.f32 %v1694_v20  ;;  %v1695_v22 = vmul.f32 0.5, %v1599_v21 }
 0x211   :  { %2270 = vtanh.f32 %v1695_v22 }
 0x218   :  { %v2265_v23 = vpop.eup %2264 }
 0x219   :  { %v1715_v24 = vadd.f32 1.0, %v2265_v23 }
 0x21a   :  { %v2267_v25 = vpop.eup %2266 }
 0x21b   :  { %v1729_v26 = vmul.f32 0.5, %v1715_v24  ;;  %v1716_v27 = vadd.f32 1.0, %v2267_v25 }
 0x21c   :  { %v2269_v29 = vpop.eup %2268 }
 0x21d   :  { %1743 = vst [vmem:[#allocation2 + $0x20] sm:$0xff] %v1729_v26  ;;  %v1730_v31 = vmul.f32 0.5, %v1716_v27  ;;  %v1722_v32 = vadd.f32 1.0, %v2269_v29 }
 0x21e   :  { %v2271_v33 = vpop.eup %2270 }
 0x21f   :  { %1744 = vst [vmem:[#allocation2 + $0x28] sm:$0xff] %v1730_v31  ;;  %v1736_v44 = vmul.f32 0.5, %v1722_v32  ;;  %v1723_v34 = vadd.f32 1.0, %v2271_v33 }
 0x221   :  { %1750 = vst [vmem:[#allocation2 + $0x58] sm:$0xff] %v1736_v44  ;;  %v1737_v35 = vmul.f32 0.5, %v1723_v34 }
 0x223   :  { %1751 = vst [vmem:[#allocation2 + $0x60] sm:$0xff] %v1737_v35  ;;  %v1676_v36 = vpop.f32.mrf.mxu0 }
 0x225   :  { %v1678_v28 = vpop.f32.mrf.mxu0 }
 0x226   :  { %v1977_v38 = vpop.f32.mrf.mxu1 }
 0x227   :  { %v1679_v39 = vpop.f32.mrf.mxu0 }
 0x228   :  { %v1978_v41 = vpop.f32.mrf.mxu1 }
 0x229   :  { %v1979_v42 = vadd.f32 %v1978_v41, %v1977_v38  ;;  %v1681_v43 = vpop.f32.mrf.mxu0 }
 0x22a   :  { %v1980_v18 = vpop.f32.mrf.mxu1 }
 0x22b   :  { %v1636_v45 = vadd.f32 %v1979_v42, %v431_v40 }
 0x22c   :  { %v1981_v46 = vpop.f32.mrf.mxu1 }
 0x22d   :  { %v1677_v15 = vadd.f32 %v1676_v36, %v1636_v45  ;;  %v1982_v48 = vadd.f32 %v1981_v46, %v1980_v18 }
 0x22f   :  { %v1689_v49 = vmul.f32 0.5, %v1677_v15  ;;  %v1639_v50 = vadd.f32 %v1982_v48, %v431_v40 }
 0x231   :  { %2272 = vtanh.f32 %v1689_v49  ;;  %v1680_v51 = vadd.f32 %v1679_v39, %v1639_v50 }
 0x233   :  { %v1696_v52 = vmul.f32 0.5, %v1680_v51 }
 0x235   :  { %2274 = vtanh.f32 %v1696_v52 }
 0x23e   :  { %v2273_v3 = vpop.eup %2272 }
 0x23f   :  { %v1717_v53 = vadd.f32 1.0, %v2273_v3 }
 0x241   :  { %v1731_v54 = vmul.f32 0.5, %v1717_v53 }
 0x242   :  { %v2275_v56 = vpop.eup %2274 }
 0x243   :  { %1745 = vst.msk [vmem:[#allocation2 + $0x30] sm:$0xff] %vm1339_vm2, %v1731_v54  ;;  %v1724_v55 = vadd.f32 1.0, %v2275_v56 }
 0x245   :  { %v1738_v57 = vmul.f32 0.5, %v1724_v55 }
 0x247   :  { %1752 = vst.msk [vmem:[#allocation2 + $0x68] sm:$0xff] %vm1339_vm2, %v1738_v57 }
 0x248   :  { %2287 = shalt.err (!%p2284_p4)
}
 0x249   :  { %s2300_s27 = smov 896   ;;  %s2301_s28 = smov 56  }
 0x24a   :  { %1764 = dma.vmem_to_hbm [thread:$0]  %s1759_s4, 1792, %s2973_s5, [#allocation3], %s2300_s27, %s2300_s27, %s2301_s28  }
 0x24b   :  { %2296 = dma.done.wait [#allocation3], 1792  }
 0x24c   :  { %2297 = vsyncadd [#allocation3], 4294965504 }
 0x24d   :  { %1768 = vsyncpa [#allocation3], 1 }

</bundles_post_ra>
